<compile_context>
chip_gen: v5e
topology: v5e:2x2
jax: 0.10.0
libtpu: 0.0.40
codegen_flags: <defaults>
</compile_context>

<pallas_src>
import functools

import jax
import jax.numpy as jnp
from jax.experimental import pallas as pl
from jax.experimental.pallas import tpu as pltpu

_LANE = 128


def _physical_vmem_bytes():
    try:
        info = pltpu.get_tpu_info()
        v = getattr(info, "vmem_capacity_bytes", None)
        if v:
            return int(v)
    except Exception:
        pass
    return 64 << 20  # conservative fallback: v7x per-TensorCore VMEM


# ----------------------------------------------------------------------------------
# Single-pass kernel: whole (C, L) per batch element fits in a VMEM block.
# ----------------------------------------------------------------------------------
def _ese_kernel(x_ref, wt_ref, b_ref, o_ref, *, channels_last):
    # x_ref : (TN, C, L) if not channels_last else (TN, L, C)   (native dtype)
    # wt_ref: (C, C) f32, pre-transposed & pre-scaled weight (W^T / L)
    # b_ref : (1, C)  f32 bias
    red_axis = 1 if channels_last else 2
    # f32-accumulated channel sums; re-read x_ref later instead of keeping the whole
    # tile live across the matmul/gate (VMEM window re-reads are cheap).
    s = jnp.sum(x_ref[...].astype(jnp.float32), axis=red_axis)            # (TN, C)
    y = jnp.dot(s, wt_ref[...], preferred_element_type=jnp.float32) + b_ref[...]
    # Note: gate is cast to the activation dtype before the multiply (bf16 inputs see
    # bf16-epsilon deltas vs an all-f32 reference).
    gate = (jnp.clip(y + 3.0, 0.0, 6.0) * (1.0 / 6.0)).astype(o_ref.dtype)
    if channels_last:
        o_ref[...] = x_ref[...] * gate[:, None, :]
    else:
        o_ref[...] = x_ref[...] * gate[:, :, None]


# ----------------------------------------------------------------------------------
# Two-pass kernels (overflow regime): pass A computes gates (L-tiled reduction),
# pass B streams x again and scales it.
# ----------------------------------------------------------------------------------
def _ese_gate_kernel(x_ref, wt_ref, b_ref, g_ref, *, channels_last, l_size, l_tile):
    # x_ref: (1, C, tl) or (1, tl, C);  g_ref: (1, 1, C) f32 (accumulator + output).
    li = pl.program_id(1)

    @pl.when(li == 0)
    def _init():
        g_ref[...] = jnp.zeros_like(g_ref)

    red_axis = 1 if channels_last else 2
    x = x_ref[...].astype(jnp.float32)
    # Mask the ragged last L block so garbage columns don't pollute the sum.
    rem = l_size - li * l_tile
    idx = jax.lax.broadcasted_iota(jnp.int32, x.shape, red_axis)
    x = jnp.where(idx < rem, x, 0.0)
    g_ref[...] += jnp.sum(x, axis=red_axis)[:, None, :]                    # (1,1,C)

    @pl.when(li == pl.num_programs(1) - 1)
    def _finalize():
        acc = g_ref[0]                                                     # (1, C)
        y = jnp.dot(acc, wt_ref[...], preferred_element_type=jnp.float32) + b_ref[...]
        g_ref[...] = (jnp.clip(y + 3.0, 0.0, 6.0) * (1.0 / 6.0))[None]


def _ese_scale_kernel(x_ref, g_ref, o_ref, *, channels_last):
    gate = g_ref[...].astype(o_ref.dtype)                                  # (1, 1, C)
    if channels_last:
        o_ref[...] = x_ref[...] * gate
    else:
        o_ref[...] = x_ref[...] * jnp.transpose(gate, (0, 2, 1))           # (1, C, 1)


def _ese_two_pass(x, wt, b2, *, channels_last, tile_budget_bytes, vmem_cap,
                  weight_res, donate_x):
    if channels_last:
        N, L, C = x.shape
    else:
        N, C, L = x.shape
    elem = jnp.dtype(x.dtype).itemsize
    row_bytes = C * elem                      # bytes per unit of L, one batch element
    headroom = 4 << 20
    max_block = max(row_bytes, (vmem_cap - weight_res - headroom) // 4)
    budget = max(row_bytes, min(tile_budget_bytes, max_block))

    # tl alignment: lane axis (NCL) needs multiples of 128, sublane axis (NLC) 8.
    align = 8 if channels_last else _LANE
    tl = max(align, (budget // row_bytes) // align * align)
    if tl >= L:
        tl = L
    grid_l = pl.cdiv(L, tl)
    grid_n = N

    if channels_last:
        x_block, x_idx = (1, tl, C), (lambda n, l: (n, l, 0))
    else:
        x_block, x_idx = (1, C, tl), (lambda n, l: (n, 0, l))

    block_bytes = tl * C * elem
    vmem_limit = int(min(max(4 * block_bytes + weight_res + headroom, 16 << 20),
                         vmem_cap))

    gate_kernel = functools.partial(
        _ese_gate_kernel, channels_last=channels_last, l_size=L, l_tile=tl)
    gates = pl.pallas_call(
        gate_kernel,
        out_shape=jax.ShapeDtypeStruct((N, 1, C), jnp.float32),
        grid_spec=pltpu.PrefetchScalarGridSpec(
            num_scalar_prefetch=0,
            grid=(grid_n, grid_l),
            in_specs=[
                pl.BlockSpec(x_block, x_idx),
                pl.BlockSpec((C, C), lambda n, l: (0, 0)),
                pl.BlockSpec((1, C), lambda n, l: (0, 0)),
            ],
            out_specs=pl.BlockSpec((1, 1, C), lambda n, l: (n, 0, 0)),
        ),
        compiler_params=pltpu.CompilerParams(
            dimension_semantics=("parallel", "arbitrary"),
            vmem_limit_bytes=vmem_limit,
        ),
        cost_estimate=pl.CostEstimate(
            flops=N * C * L + 2 * N * C * C,
            transcendentals=0,
            bytes_accessed=N * C * L * elem + C * C * 4 + N * C * 4,
        ),
    )(x, wt, b2)

    scale_kernel = functools.partial(_ese_scale_kernel, channels_last=channels_last)
    return pl.pallas_call(
        scale_kernel,
        out_shape=jax.ShapeDtypeStruct(x.shape, x.dtype),
        grid_spec=pltpu.PrefetchScalarGridSpec(
            num_scalar_prefetch=0,
            grid=(grid_n, grid_l),
            in_specs=[
                pl.BlockSpec(x_block, x_idx),
                pl.BlockSpec((1, 1, C), lambda n, l: (n, 0, 0)),
            ],
            out_specs=pl.BlockSpec(x_block, x_idx),
        ),
        compiler_params=pltpu.CompilerParams(
            dimension_semantics=("parallel", "parallel"),
            vmem_limit_bytes=vmem_limit,
        ),
        cost_estimate=pl.CostEstimate(
            flops=N * C * L,
            transcendentals=0,
            bytes_accessed=2 * N * C * L * elem + N * C * 4,
        ),
        input_output_aliases=({0: 0} if donate_x else {}),
    )(x, gates)


# ----------------------------------------------------------------------------------
# Dispatcher
# ----------------------------------------------------------------------------------
def _ese_pallas(x, w, b, *, channels_last, tile_budget_bytes=None,
                donate_x=False, force_two_pass=False):
    if channels_last:
        N, L, C = x.shape
    else:
        N, C, L = x.shape
    assert w.shape == (C, C, 1) and b.shape == (C,)

    # 1x1-conv weight, transposed so y = sum_x_over_L @ wt + b (mean's 1/L folded in);
    # the divide is done in f32 to avoid low-precision scaling of the weights.
    wt = jnp.transpose(w[:, :, 0]).astype(jnp.float32) / jnp.float32(L)
    b2 = b.reshape(1, C).astype(jnp.float32)

    elem = jnp.dtype(x.dtype).itemsize
    per_batch = C * L * elem

    vmem_phys = _physical_vmem_bytes()
    vmem_cap = (vmem_phys // 8) * 7            # ~87.5%: leave compiler-scratch headroom
    if tile_budget_bytes is None:              # bigger tiles on 128-MiB v5e/v6e
        tile_budget_bytes = (12 << 20) if vmem_phys >= (128 << 20) else (8 << 20)
    weight_res = 2 * (C * C * 4 + C * 4)       # weight + bias, double-buffered resident
    headroom = 4 << 20
    max_single_tile = max(0, vmem_cap - weight_res - headroom) // 4
    # TODO(synk): if 2*C*C*4 itself exceeds VMEM (C ≳ 2600 on v7x) the weight would
    # also need C-tiling; not implemented (far beyond VoVNet channel counts).

    if force_two_pass or per_batch > max_single_tile:
        return _ese_two_pass(x, wt, b2, channels_last=channels_last,
                             tile_budget_bytes=tile_budget_bytes, vmem_cap=vmem_cap,
                             weight_res=weight_res, donate_x=donate_x)

    # ----- single-pass path -----
    budget = min(max(tile_budget_bytes, per_batch), max_single_tile)
    tn = max(1, budget // per_batch)
    if N >= 2:
        tn = min(tn, pl.cdiv(N, 2))            # >= 2 grid steps → shardable on v7x's 2 TCs
    tn = min(tn, N)
    grid_n = pl.cdiv(N, tn)                    # ragged last block handled by Pallas masks

    tile_bytes = tn * per_batch
    vmem_limit = int(min(max(4 * tile_bytes + weight_res + headroom, 16 << 20), vmem_cap))

    block = (tn, L, C) if channels_last else (tn, C, L)
    kernel = functools.partial(_ese_kernel, channels_last=channels_last)

    return pl.pallas_call(
        kernel,
        out_shape=jax.ShapeDtypeStruct(x.shape, x.dtype),
        grid_spec=pltpu.PrefetchScalarGridSpec(
            num_scalar_prefetch=0,
            grid=(grid_n,),
            in_specs=[
                pl.BlockSpec(block, lambda n: (n, 0, 0)),   # x: TN batch elems / step
                pl.BlockSpec((C, C), lambda n: (0, 0)),     # weight (resident)
                pl.BlockSpec((1, C), lambda n: (0, 0)),     # bias   (resident)
            ],
            out_specs=pl.BlockSpec(block, lambda n: (n, 0, 0)),
        ),
        compiler_params=pltpu.CompilerParams(
            dimension_semantics=("parallel",),
            vmem_limit_bytes=vmem_limit,
        ),
        cost_estimate=pl.CostEstimate(
            flops=2 * N * C * L + 2 * N * C * C,
            transcendentals=0,
            bytes_accessed=2 * N * C * L * elem + C * C * 4 + C * 4,
        ),
        input_output_aliases=({0: 0} if donate_x else {}),
    )(x, wt, b2)


def ese_forward(x, w, b, *, layout_dispatch=True, **kw):
    """x: (N, C, L) (PyTorch Conv1d layout); w: (C, C, 1); b: (C,)."""
    N, C, L = x.shape
    if layout_dispatch and (L % _LANE != 0) and (C % _LANE == 0):
        # Lane-dense route: with an L-minor output and L % 128 != 0 every output row
        # ends in masked partial-lane stores (worst on v5e's single vst slot). Put C
        # on the lane axis instead: transpose to NLC, run, transpose back.
        kw.pop("donate_x", None)   # donation applies to the temp, not the caller's x
        x_nlc = jnp.transpose(x, (0, 2, 1))
        out = _ese_pallas(x_nlc, w, b, channels_last=True, **kw)
        return jnp.transpose(out, (0, 2, 1))
    return _ese_pallas(x, w, b, channels_last=False, **kw)


def ese_forward_nlc(x, w, b, **kw):
    """x: (N, L, C) channels-last; lane axis = C (preferred when L < 128, C % 128 == 0)."""
    return _ese_pallas(x, w, b, channels_last=True, **kw)


def ese_reference(x, w, b):
    # Pure-JAX reference mirroring the PyTorch forward (NCL layout, f32 math).
    xf = x.astype(jnp.float32)
    y = jnp.mean(xf, axis=2, keepdims=True)                                  # (N, C, 1)
    y = jnp.einsum("oc,ncl->nol", w[:, :, 0].astype(jnp.float32), y)
    y = y + b.astype(jnp.float32)[None, :, None]
    gate = jnp.clip(y + 3.0, 0.0, 6.0) / 6.0
    return xf * gate


if __name__ == "__main__":
    key = jax.random.PRNGKey(0)
    kx1, kx2, kx3, kx4, kx5, kw, kb = jax.random.split(key, 7)

    # --- Case 1: NCL layout (matches the PyTorch module), f32, small shapes. ---------
    N, C, L = 2, 8, 16
    x = jax.random.normal(kx1, (N, C, L), dtype=jnp.float32)
    w = jax.random.normal(kw, (C, C, 1), dtype=jnp.float32) * 0.1
    b = jax.random.normal(kb, (C,), dtype=jnp.float32) * 0.1
    out = jax.block_until_ready(ese_forward(x, w, b))
    ref = ese_reference(x, w, b)
    assert out.shape == (N, C, L)
    assert jnp.allclose(out, ref, atol=1e-5, rtol=1e-5), "case 1 (NCL) mismatch"

    # --- Case 2: channels-last single-pass path, bf16, lane axis = C. ----------------
    N2, L2, C2 = 4, 16, 128
    x2 = jax.random.normal(kx2, (N2, L2, C2), dtype=jnp.float32).astype(jnp.bfloat16)
    w2 = jax.random.normal(kw, (C2, C2, 1), dtype=jnp.float32) * 0.05
    b2 = jax.random.normal(kb, (C2,), dtype=jnp.float32) * 0.05
    out2 = jax.block_until_ready(ese_forward_nlc(x2, w2, b2))
    ref2 = jnp.transpose(ese_reference(jnp.transpose(x2, (0, 2, 1)), w2, b2), (0, 2, 1))
    assert out2.shape == (N2, L2, C2) and out2.dtype == jnp.bfloat16
    assert jnp.allclose(out2.astype(jnp.float32), ref2, atol=3e-2, rtol=3e-2), \
        "case 2 (NLC/bf16) mismatch"

    # --- Case 3: two-pass split path (forced), NCL, ragged L tiling. -----------------
    N3, C3, L3 = 2, 8, 200
    x3 = jax.random.normal(kx3, (N3, C3, L3), dtype=jnp.float32)
    w3 = jax.random.normal(kw, (C3, C3, 1), dtype=jnp.float32) * 0.1
    b3 = jax.random.normal(kb, (C3,), dtype=jnp.float32) * 0.1
    out3 = jax.block_until_ready(
        ese_forward(x3, w3, b3, layout_dispatch=False,
                    force_two_pass=True, tile_budget_bytes=4096))
    ref3 = ese_reference(x3, w3, b3)
    assert jnp.allclose(out3, ref3, atol=1e-4, rtol=1e-4), "case 3 (two-pass NCL) mismatch"

    # --- Case 4: lane-dense layout dispatch (NCL input, L<128, C%128==0). ------------
    N4, C4, L4 = 2, 128, 16
    x4 = jax.random.normal(kx4, (N4, C4, L4), dtype=jnp.float32)
    w4 = jax.random.normal(kw, (C4, C4, 1), dtype=jnp.float32) * 0.05
    b4 = jax.random.normal(kb, (C4,), dtype=jnp.float32) * 0.05
    out4 = jax.block_until_ready(ese_forward(x4, w4, b4))
    ref4 = ese_reference(x4, w4, b4)
    assert out4.shape == (N4, C4, L4)
    assert jnp.allclose(out4, ref4, atol=1e-4, rtol=1e-4), "case 4 (dispatch) mismatch"

    # --- Case 5: two-pass split path (forced), NLC bf16, ragged sublane L tiling. ----
    N5, L5, C5 = 2, 72, 128
    x5 = jax.random.normal(kx5, (N5, L5, C5), dtype=jnp.float32).astype(jnp.bfloat16)
    out5 = jax.block_until_ready(
        ese_forward_nlc(x5, w2, b2, force_two_pass=True, tile_budget_bytes=8192))
    ref5 = jnp.transpose(ese_reference(jnp.transpose(x5, (0, 2, 1)), w2, b2), (0, 2, 1))
    assert jnp.allclose(out5.astype(jnp.float32), ref5, atol=3e-2, rtol=3e-2), \
        "case 5 (two-pass NLC/bf16) mismatch"

    print("KERNEL_OK")
</pallas_src>

<mosaic_0001>
module attributes {stable_mosaic.version = 11 : i64} {
  func.func @_ese_kernel(%arg0: i32, %arg1: memref<1x8x16xf32, #tpu.memory_space<vmem>>, %arg2: memref<8x8xf32, #tpu.memory_space<vmem>>, %arg3: memref<1x8xf32, #tpu.memory_space<vmem>>, %arg4: memref<1x8x16xf32, #tpu.memory_space<vmem>>) attributes {dimension_semantics = [#tpu.dimension_semantics<parallel>], iteration_bounds = array<i64: 2>, scalar_prefetch = 0 : i64, scratch_operands = 0 : i64, tpu.core_type = #tpu.core_type<tc>, window_params = [{transform_indices = @transform_0, window_bounds = array<i64: 1, 8, 16>}, {pipeline_mode = #tpu.pipeline_mode<synchronous>, transform_indices = @transform_1, window_bounds = array<i64: 8, 8>}, {pipeline_mode = #tpu.pipeline_mode<synchronous>, transform_indices = @transform_2, window_bounds = array<i64: 1, 8>}, {transform_indices = @transform_3, window_bounds = array<i64: 1, 8, 16>}]} {
    %c0 = arith.constant 0 : index
    %c0_0 = arith.constant 0 : index
    %c0_1 = arith.constant 0 : index
    %0 = vector.load %arg1[%c0, %c0_0, %c0_1] : memref<1x8x16xf32, #tpu.memory_space<vmem>>, vector<1x8x16xf32>
    %cst = arith.constant dense<0.000000e+00> : vector<1x8xf32>
    %1 = vector.multi_reduction <add>, %0, %cst [2] : vector<1x8x16xf32> to vector<1x8xf32>
    %c0_2 = arith.constant 0 : index
    %c0_3 = arith.constant 0 : index
    %2 = vector.load %arg2[%c0_2, %c0_3] : memref<8x8xf32, #tpu.memory_space<vmem>>, vector<8x8xf32>
    %cst_4 = arith.constant dense<0.000000e+00> : vector<1x8xf32>
    %3 = tpu.matmul %1, %2, %cst_4 {dimension_numbers = #tpu.dot_dimension_numbers<[1], [0], [0], [1], [0, 0, 1, 1], [], []>} : vector<1x8xf32>, vector<8x8xf32>, vector<1x8xf32> -> vector<1x8xf32>
    %c0_5 = arith.constant 0 : index
    %c0_6 = arith.constant 0 : index
    %4 = vector.load %arg3[%c0_5, %c0_6] : memref<1x8xf32, #tpu.memory_space<vmem>>, vector<1x8xf32>
    %5 = arith.addf %3, %4 : vector<1x8xf32>
    %cst_7 = arith.constant 3.000000e+00 : f32
    %6 = vector.broadcast %cst_7 : f32 to vector<1x8xf32>
    %7 = arith.addf %5, %6 : vector<1x8xf32>
    %cst_8 = arith.constant 0.000000e+00 : f32
    %cst_9 = arith.constant 6.000000e+00 : f32
    %8 = vector.broadcast %cst_8 : f32 to vector<1x8xf32>
    %9 = arith.maximumf %8, %7 : vector<1x8xf32>
    %10 = vector.broadcast %cst_9 : f32 to vector<1x8xf32>
    %11 = arith.minimumf %10, %9 : vector<1x8xf32>
    %cst_10 = arith.constant 0.166666672 : f32
    %12 = vector.broadcast %cst_10 : f32 to vector<1x8xf32>
    %13 = arith.mulf %11, %12 : vector<1x8xf32>
    %c0_11 = arith.constant 0 : index
    %c0_12 = arith.constant 0 : index
    %c0_13 = arith.constant 0 : index
    %14 = vector.load %arg1[%c0_11, %c0_12, %c0_13] : memref<1x8x16xf32, #tpu.memory_space<vmem>>, vector<1x8x16xf32>
    %15 = vector.shape_cast %13 : vector<1x8xf32> to vector<1x8x1xf32>
    %16 = vector.broadcast %15 : vector<1x8x1xf32> to vector<1x8x16xf32>
    %17 = arith.mulf %14, %16 : vector<1x8x16xf32>
    %c0_14 = arith.constant 0 : index
    %c0_15 = arith.constant 0 : index
    %c0_16 = arith.constant 0 : index
    %18 = vector.load %arg4[%c0_14, %c0_15, %c0_16] : memref<1x8x16xf32, #tpu.memory_space<vmem>>, vector<1x8x16xf32>
    tpu.vector_store %arg4[%c0_14, %c0_15, %c0_16], %17 {strides = array<i32>} : memref<1x8x16xf32, #tpu.memory_space<vmem>>, vector<1x8x16xf32>,
    return
  }
  func.func @transform_0(%arg0: i32) -> (i32, i32, i32) {
    %c0_i32 = arith.constant 0 : i32
    %c0_i32_0 = arith.constant 0 : i32
    %c0_i32_1 = arith.constant 0 : i32
    return %arg0, %c0_i32, %c0_i32_0 : i32, i32, i32
  }
  func.func @transform_1(%arg0: i32) -> (i32, i32) {
    %c0_i32 = arith.constant 0 : i32
    %c0_i32_0 = arith.constant 0 : i32
    %c0_i32_1 = arith.constant 0 : i32
    return %c0_i32, %c0_i32_0 : i32, i32
  }
  func.func @transform_2(%arg0: i32) -> (i32, i32) {
    %c0_i32 = arith.constant 0 : i32
    %c0_i32_0 = arith.constant 0 : i32
    %c0_i32_1 = arith.constant 0 : i32
    return %c0_i32, %c0_i32_0 : i32, i32
  }
  func.func @transform_3(%arg0: i32) -> (i32, i32, i32) {
    %c0_i32 = arith.constant 0 : i32
    %c0_i32_0 = arith.constant 0 : i32
    %c0_i32_1 = arith.constant 0 : i32
    return %arg0, %c0_i32, %c0_i32_0 : i32, i32, i32
  }
}

</mosaic_0001>

<bundles_post_ra>
// kernel: tpu_custom_call.1
= control target key start
LH: loop header
LB: loop body
LE: loop exit
PB: predicated region body
PF: predicated region fallthrough
CT: control target
= control target key end

     0   :  { %8 = vsyncpa [#allocation3], 0  ;;  %s719_s0 = inlined_call_operand.hbm [shape: f32[2,8,16], index: 0, kind: input, shape index: {}]   ;;  %s720_s1 = inlined_call_operand.hbm [shape: f32[8,8], index: 1, kind: input, shape index: {}]   ;;  %s721_s2 = inlined_call_operand.vmem [shape: f32[1,8], index: 2, kind: input, shape index: {}]   ;;  %s722_s3 = inlined_call_operand.hbm [shape: f32[2,8,16], index: 3, kind: output, shape index: {}]  }
   0x1   :  { %10 = vsyncpa [#allocation3 + $0x1], 0 }
   0x2   :  { %11 = vsyncpa [#allocation6], 0 }
   0x3   :  { %12 = vsyncpa [#allocation4], 0 }
   0x4   :  { %14 = vsyncpa [#allocation4 + $0x1], 0  ;;  %s572_s12 = smov 0   ;;  %s574_s13 = smov 0  }
   0x5   :  { %s576_s14 = smov 0   ;;  %s578_s15 = smov 0  }
   0x6 LB: > { %s593_s16 = sadd.s32 4294967295, %s549_s15   ;;  %s346_s17 = sadd.s32 4294967294, %s549_s15   ;;  %s549_s15 = sphi %s578_s15, %s732_s15   ;;  %s545_s14 = sphi %s576_s14, %s731_s14   ;;  %s541_s13 = sphi %s574_s13, %s730_s13   ;;  %s537_s12 = sphi %s572_s12, %s729_s12  }
   0x7   : > { %p40_p0 = scmp.ne.s32.totalorder %s541_s13, %s537_s12  ;;  %p41_p1 = scmp.eq.s32.totalorder %s593_s16, 0 }
   0x8   : > { %p106_p2 = scmp.eq.s32.totalorder %s593_s16, 1  ;;  %p112_p3 = scmp.eq.s32.totalorder %s346_s17, 1 }
   0x9   : > { %p602_p4 = por %p41_p1, %p40_p0  ;;  %p347_p5 = scmp.ge.s32.totalorder %s549_s15, 1 }
   0xa   : > { %p607_p6 = por %p112_p3, %p40_p0  ;;  %p119_p7 = scmp.lt.s32.totalorder %s549_s15, 3 }
   0xb   : > { %s131_s22 = sshll.u32 %s720_s1, 4  ;;  %s551_s24 = smov [#allocation5]   ;;  %s132_s22 = int_to_ptr.hbm [resolvable:$true] %s131_s22 }
   0xc   : > { %p615_p8 = pnand %p347_p5, %p119_p7  ;;  %s133_s25 = sshll.u32 %s551_s24, 4  ;;  %s134_s25 = int_to_ptr.vmem [resolvable:$true] %s133_s25 }
   0xd   : > { %s625_s26 = sadd.s32 1, %s549_s15   ;;  %s27_s27 = sadd.s32 1, %s545_s14 }
   0xe   : > { %p369_p10 = pneg %p615_p8  ;;  %s24_s28 = ssub.s32 %s549_s15, %s625_s26 }
   0xf   : > { %p25_p12 = scmp.eq.s32.totalorder %s24_s28, 0  ;;  %p34_p13 = scmp.ne.s32.totalorder %s545_s14, %s541_s13 }
  0x10   : > { %p370_p11 = pnand %p369_p10, %p41_p1  ;;  %p35_p0 = scmp.eq.s32.totalorder %s549_s15, 0 }
  0x11   : > { %s634_s29 = scalar_select %p25_p12, %s545_s14, %s27_s27  }
  0x12   : > { %372 = dma.hbm_to_vmem [thread:$0]  (!%p370_p11), %s132_s22, 128, %s134_s25, [#allocation6]  }
  0x13   : > { %p638_p3 = por %p106_p2, %p34_p13  ;;  %p382_p5 = scmp.lt.s32.totalorder %s549_s15, 2 }
  0x14   : > { %s147_s4 = sand.u32 1, %s545_s14   ;;  %s351_s5 = sshll.u32 %s549_s15, 3 }
  0x15   : > { %p36_p7 = por %p35_p0, %p34_p13  ;;  %s350_s6 = sshll.u32 %s147_s4, 3 }
  0x16   : > { %s155_s9 = scalar_lea.hbm %s719_s0, %s351_s5  ;;  %s151_s11 = scalar_lea.vmem [#allocation2], %s350_s6 }
  0x17   : > { %s157_s10 = sshll.u32 %s155_s9, 4  ;;  %s159_s17 = sshll.u32 %s151_s11, 4  ;;  %s158_s10 = int_to_ptr.hbm [resolvable:$true] %s157_s10  ;;  %s160_s17 = int_to_ptr.vmem [resolvable:$true] %s159_s17 }
  0x18   : > { %p648_p10 = pnand %p382_p5, %p36_p7  ;;  %s148_s21 = scalar_lea.sflag [#allocation3], %s147_s4 }
  0x19   : > { %s449_s22 = sshra.s32 %s158_s10, 4  ;;  %s456_s28 = scalar_lea.hbm %s719_s0, 16  ;;  %s450_s22 = int_to_ptr.hbm [resolvable:$true] %s449_s22 }
  0x1a   : > { %s451_s24 = scalar_lea.hbm %s450_s22, 8  ;;  %p453_p11 = pneg %p648_p10 }
  0x1b   : > { %p452_p2 = scmp.ne.s32.totalorder %s450_s22, %s451_s24  ;;  %p457_p0 = scmp.lt.s32.totalorder %s450_s22, %s719_s0 }
  0x1c   : > { %p458_p5 = scmp.lt.s32.totalorder %s456_s28, %s451_s24 }
  0x1d   : > { %p454_p12 = pnand %p453_p11, %p452_p2 }
  0x1e   : > { %p459_p7 = por %p458_p5, %p457_p0 }
  0x1f   : > { %p455_p13 = pneg %p454_p12 }
  0x21   : > { %p460_p9 = pnand %p459_p7, %p455_p13 }
  0x23   : > { %463 = shalt.err (!%p460_p9)
}
  0x24   : > { %376 = dma.hbm_to_vmem [thread:$0]  (!%p648_p10), %s158_s10, 128, %s160_s17, %s148_s21  }
  0x25   : > { %168 = sbr.rel (%p615_p8) target bundleno = 423 (0x1a7), region = 32  ;;  %s665_s4 = sand.u32 (!%p615_p8), 1, %s541_s13  }
  0x26   : > { %s353_s7 = sshll.u32 (!%p615_p8), %s665_s4, 3  ;;  %s171_s8 = scalar_lea.sflag (!%p615_p8), [#allocation3], %s665_s4 }
  0x27   : > { %s174_s9 = scalar_lea.vmem (!%p615_p8), [#allocation2], %s353_s7 }
  0x2a   : > { %524 = dma.done.wait (%p602_p4), %s171_s8, 128  }
  0x2b   : > { %526 = vsyncadd (%p602_p4), %s171_s8, 4294967168 }
  0x2c   : > { %528 = dma.done.wait (%p41_p1), [#allocation6], 128  }
  0x2d   : > { %530 = vsyncadd (%p41_p1), [#allocation6], 4294967168  ;;  %vm204_vm0 = vcmask 130048   ;;  %v203_v0 = vld [vmem:[%s174_s9] sm:$0xff]  ;;  %v208_v2 = vld [vmem:[#allocation5] sm:$0xff]  ;;  %v211_v3 = vlaneseq  ;;  %vm214_vm1 = vcmask 64512  }
  0x2e   : > { %v205_v1 = vsel %vm204_vm0, %v203_v0, 0.0  ;;  %232 = vmatpush.msra.mxu0 %v208_v2  ;;  %v209_v8 = vld [vmem:[%s721_s2] sm:$0x1]  ;;  %s358_s10 = sshll.u32 %s593_s16, 3  ;;  %s202_s21 = scalar_lea.vmem [#allocation7], %s353_s7 }
  0x2f   : > { %206 = vadd.xlane.f32.xlu0 %v205_v1  ;;  %v212_v4 = vand.u32 127, %v211_v3  ;;  %v243_v7 = vshrl.u32 %v211_v3, 7  ;;  %s261_s20 = scalar_lea.hbm %s722_s3, %s358_s10  ;;  %s263_s22 = sshll.u32 %s202_s21, 4  ;;  %s264_s22 = int_to_ptr.vmem [resolvable:$true] %s263_s22 }
  0x30   : > { %s265_s24 = sshll.u32 %s261_s20, 4  ;;  %s251_s25 = scalar_lea.sflag [#allocation4], %s665_s4  ;;  %s266_s24 = int_to_ptr.hbm [resolvable:$true] %s265_s24 }
  0x31   : > { %418 = vset.pattern.permute.xlu0 %v243_v7  ;;  %s493_s27 = sshra.s32 %s266_s24, 4  ;;  %s499_s6 = scalar_lea.hbm %s722_s3, 16  ;;  %s494_s27 = int_to_ptr.hbm [resolvable:$true] %s493_s27 }
  0x32   : > { %s495_s28 = scalar_lea.hbm %s494_s27, 8  ;;  %p500_p9 = scmp.lt.s32.totalorder %s494_s27, %s722_s3 }
  0x33   : > { %p496_p1 = scmp.ne.s32.totalorder %s494_s27, %s495_s28  ;;  %p501_p10 = scmp.lt.s32.totalorder %s499_s6, %s495_s28 }
  0x35   : > { %p497_p4 = pnand %p496_p1, %p638_p3  ;;  %p502_p2 = por %p501_p10, %p500_p9 }
  0x37   : > { %p498_p8 = pneg %p497_p4 }
  0x39   : > { %p503_p11 = pnand %p502_p2, %p498_p8 }
  0xa2   : > { %v207_v5 = vpop.xlane.xlu0 %206 }
  0xa3   : > { %v213_v6 = vperm.slane %v207_v5, %v212_v4 }
  0xa5   : > { %356 = vmatmul.msk.f32.vlgmr.msra.gmra.mxu0 %vm214_vm1, %v213_v6 }
 0x122   : > { %v234_v9 = vpop.f32.mrf.mxu0 }
 0x123   : > { %v235_v10 = vadd.f32 %v234_v9, %v209_v8 }
 0x125   : > { %v237_v11 = vadd.f32 3.0, %v235_v10 }
 0x127   : > { %v238_v12 = vmax.f32 %v237_v11, 0.0 }
 0x129   : > { %v239_v13 = vmin.f32 %v238_v12, 6.0 }
 0x12b   : > { %v240_v14 = vmul.f32 0.16666667, %v239_v13 }
 0x12d   : > { %v241_v15 = vperm.slane %v240_v14, 0 }
 0x12f   : > { %246 = vperm.xlu0 %418, %v241_v15  }
 0x1a1   : > { %v247_v16 = vpop.permute.xlu0 %246 }
 0x1a2   : > { %v248_v17 = vmul.f32 %v247_v16, %v203_v0 }
 0x1a4   : > { %249 = vst.msk [vmem:[%s202_s21] sm:$0xff] %vm204_vm0, %v248_v17 }
 0x1a5   : > { %506 = shalt.err (!%p503_p11)
}
 0x1a6   : > { %367 = dma.vmem_to_hbm [thread:$0]  (%p638_p3), %s264_s22, 128, %s266_s24, %s251_s25  }
 0x1a7 PF: > { %s277_s4 = sand.u32 1, %s537_s12   ;;  %p728_p12 = scmp.ge.s32.totalorder %s549_s15, 2 }
 0x1a8   : > { %s278_s9 = scalar_lea.sflag [#allocation4], %s277_s4 }
 0x1a9   : > { %p378_p13 = pnand %p728_p12, %p607_p6 }
 0x1ab   : > { %p379_p0 = pneg %p378_p13 }
 0x1ad   : > { %532 = dma.done.wait (%p379_p0), %s278_s9, 128  }
 0x1ae   : > { %534 = vsyncadd (%p379_p0), %s278_s9, 4294967168  ;;  %p17_p5 = scmp.ge.s32.totalorder %s625_s26, 4   ;;  %s729_s12 = smov %s541_s13 }
 0x1af   : > { %s730_s13 = smov %s545_s14  ;;  %s731_s14 = smov %s634_s29 }
 0x1b0   : > { %s732_s15 = smov %s625_s26  ;;  %19 = sbr.rel (!%p17_p5) target bundleno = 6 (0x6), region = 81 }
 0x1b5   :  { %284 = vsyncpa [#allocation3], 1 }
 0x1b6   :  { %286 = vsyncpa [#allocation3 + $0x1], 1 }
 0x1b7   :  { %287 = vsyncpa [#allocation6], 1 }
 0x1b8   :  { %288 = vsyncpa [#allocation4], 1 }
 0x1b9   :  { %290 = vsyncpa [#allocation4 + $0x1], 1 }

</bundles_post_ra>
